<compile_context>
chip_gen: v7x
topology: tpu7x:2x2x1
jax: 0.10.0
libtpu: 0.0.40
codegen_flags: <defaults>
</compile_context>

<pallas_src>
import functools

import numpy as np
import jax
import jax.numpy as jnp
from jax.experimental import pallas as pl
from jax.experimental.pallas import tpu as pltpu


# Spatial / query tile widths (lane axis).  S_BLK >= 256 keeps MXU fill
# amortized and lets v7x split the "parallel" grid across its 2 TCs; bump to
# 512 on v5e (1 vst slot) at production sizes.
S_BLK = 256
N_BLK = 128

_VMEM_LIMIT = 32 * 1024 * 1024


def _fb(shape):
    """Full-array block for a grid=(1,) pallas_call (block == array dims)."""
    n = len(shape)
    return pl.BlockSpec(shape, lambda i, n=n: (0,) * n)


# ---------------------------------------------------------------------------
# Pallas kernels
# ---------------------------------------------------------------------------
def _encode_compose_kernel(vxy_ref, vxz_ref, vyz_ref,
                           wxy_ref, wxz_ref, wyz_ref, b_ref, out_ref):
    # One launch for all three triplane encoders + compose.  Mean-pool is
    # folded into the expanded bf16 weights (K = R*Cin).  Output is the
    # block-flat composed map (C, S_pad); each plane is stored to a
    # 128-aligned lane range -> unmasked dense stores.
    b = b_ref[...]                                    # (C, 1) f32

    def plane(v_ref, w_ref):
        # (K, C) x (S, K) -> (C, S) via dot_general (MXU, f32 accumulation).
        return jax.lax.dot_general(
            w_ref[...], v_ref[...].astype(jnp.bfloat16),
            (((0,), (1,)), ((), ())),
            preferred_element_type=jnp.float32) + b

    n_xy = vxy_ref.shape[0]
    n_xz = vxz_ref.shape[0]
    n_yz = vyz_ref.shape[0]
    out_ref[:, 0:n_xy] = plane(vxy_ref, wxy_ref)
    out_ref[:, n_xy:n_xy + n_xz] = plane(vxz_ref, wxz_ref)
    out_ref[:, n_xy + n_xz:n_xy + n_xz + n_yz] = plane(vyz_ref, wyz_ref)
    s_tot = n_xy + n_xz + n_yz
    if out_ref.shape[1] > s_tot:                      # lane-alignment tail
        out_ref[:, s_tot:] = jnp.zeros(
            (out_ref.shape[0], out_ref.shape[1] - s_tot), out_ref.dtype)


def _denoise_kernel(x_ref, cond_ref, y_ref, w1_ref, b1_ref, w2_ref, b2_ref,
                    out_ref, *, num_steps, unroll):
    # Whole diffusion sampler for one (C, S_BLK) spatial tile.  Layout is
    # channel-first so the spatial axis sits on lanes (dense vregs, dense
    # stores, MXU N = S_BLK).  Per step:
    #   h   = relu(W1^T @ (x + cond) + b1)
    #   eps = W2^T @ h + b2
    #   x  <- x - 0.1 * eps
    x0 = x_ref[...]                                   # (C, S_BLK) f32
    cond = cond_ref[...] + y_ref[...]                 # fold the y mask in once
    w1 = w1_ref[...]                                  # (Ch, C) bf16
    w2 = w2_ref[...]                                  # (C, Ch) bf16
    s = x0.shape[1]
    # Hoist bias broadcasts out of the loop (JAX does not CSE broadcasts).
    b1 = jnp.broadcast_to(b1_ref[...], (w1.shape[0], s))
    b2 = jnp.broadcast_to(b2_ref[...], (w2.shape[0], s))

    def body(_, x):
        xc = (x + cond).astype(jnp.bfloat16)          # bf16 MXU operands
        h = jnp.dot(w1, xc, preferred_element_type=jnp.float32) + b1
        h = jnp.maximum(h, 0.0)
        eps = jnp.dot(w2, h.astype(jnp.bfloat16),
                      preferred_element_type=jnp.float32) + b2
        return x - 0.1 * eps                          # VPU epilogue in f32

    out_ref[...] = jax.lax.fori_loop(0, num_steps, body, x0, unroll=unroll)


def _decode_kernel(idx_ref, feat_ref, w1_ref, b1_ref, w2_ref, b2_ref,
                   out_ref, *, n_cls):
    # Fused decode for one tile of N_BLK queries: triplane gather (one-hot
    # matmul against the block-flat composed map -> decompose is pure index
    # arithmetic done host-side once) + MLP head + argmax -> int32 labels.
    # TODO(synk): scalar-prefetch/DMA gather at production Spp.
    feat = feat_ref[...].astype(jnp.bfloat16)         # (C, S_pad)
    idx = idx_ref[...]                                # (3, N_BLK) int32
    spp = feat.shape[1]
    n = idx.shape[1]
    one = jnp.bfloat16(1.0)
    zero = jnp.bfloat16(0.0)

    col = jax.lax.broadcasted_iota(jnp.int32, (spp, n), 0)
    sel = (jnp.where(col == idx[0:1, :], one, zero)   # xy gather
           + jnp.where(col == idx[1:2, :], one, zero)  # xz gather
           + jnp.where(col == idx[2:3, :], one, zero))  # yz gather (Spp, N)

    f_t = jnp.dot(feat, sel, preferred_element_type=jnp.float32)   # (C, N)
    h = jnp.dot(w1_ref[...], f_t.astype(jnp.bfloat16),
                preferred_element_type=jnp.float32) + b1_ref[...]
    h = jnp.maximum(h, 0.0)
    logits = jnp.dot(w2_ref[...], h.astype(jnp.bfloat16),
                     preferred_element_type=jnp.float32) + b2_ref[...]
    # argmax over classes (sublane axis), first-max tie-break like jnp.argmax.
    m = jnp.max(logits, axis=0, keepdims=True)                      # (1, N)
    row = jax.lax.broadcasted_iota(jnp.int32, logits.shape, 0).astype(jnp.float32)
    lbl = jnp.min(jnp.where(logits == m, row, jnp.float32(n_cls)),
                  axis=0, keepdims=True)
    out_ref[...] = lbl.astype(jnp.int32)                            # (1, N)


# ---------------------------------------------------------------------------
# pallas_call wrappers
# ---------------------------------------------------------------------------
def encode_compose(v_xy, v_xz, v_yz, w_xy, w_xz, w_yz, b, s_pad):
    c = b.shape[0]
    specs = [_fb(a.shape) for a in (v_xy, v_xz, v_yz, w_xy, w_xz, w_yz, b)]
    return pl.pallas_call(
        _encode_compose_kernel,
        out_shape=jax.ShapeDtypeStruct((c, s_pad), jnp.float32),
        grid=(1,),
        in_specs=specs,
        out_specs=_fb((c, s_pad)),
        compiler_params=pltpu.CompilerParams(
            dimension_semantics=("arbitrary",), vmem_limit_bytes=_VMEM_LIMIT),
    )(v_xy, v_xz, v_yz, w_xy, w_xz, w_yz, b)


def denoise_fused(x0, cond, y, w1t, b1c, w2t, b2c, num_steps):
    c, s = x0.shape
    ch = w1t.shape[0]
    assert s % S_BLK == 0
    kernel = functools.partial(_denoise_kernel, num_steps=num_steps,
                               unroll=max(1, min(4, num_steps)))
    return pl.pallas_call(
        kernel,
        out_shape=jax.ShapeDtypeStruct((c, s), jnp.float32),
        grid=(s // S_BLK,),
        in_specs=[
            pl.BlockSpec((c, S_BLK), lambda i: (0, i)),    # x0
            pl.BlockSpec((c, S_BLK), lambda i: (0, i)),    # cond
            pl.BlockSpec((1, S_BLK), lambda i: (0, i)),    # y mask
            pl.BlockSpec((ch, c), lambda i: (0, 0)),       # w1^T (bf16)
            pl.BlockSpec((ch, 1), lambda i: (0, 0)),       # b1
            pl.BlockSpec((c, ch), lambda i: (0, 0)),       # w2^T (bf16)
            pl.BlockSpec((c, 1), lambda i: (0, 0)),        # b2
        ],
        out_specs=pl.BlockSpec((c, S_BLK), lambda i: (0, i)),
        compiler_params=pltpu.CompilerParams(
            dimension_semantics=("parallel",),             # v7x 2-TC split
            vmem_limit_bytes=_VMEM_LIMIT),
    )(x0, cond, y, w1t, b1c, w2t, b2c)


def decode_labels(flat_idx, feat, w1t, b1c, w2t, b2c):
    n = flat_idx.shape[1]
    c, s = feat.shape
    hd = w1t.shape[0]
    ncls = w2t.shape[0]
    assert n % N_BLK == 0
    kernel = functools.partial(_decode_kernel, n_cls=ncls)
    return pl.pallas_call(
        kernel,
        out_shape=jax.ShapeDtypeStruct((1, n), jnp.int32),
        grid=(n // N_BLK,),
        in_specs=[
            pl.BlockSpec((3, N_BLK), lambda j: (0, j)),    # flat gather idx
            pl.BlockSpec((c, s), lambda j: (0, 0)),        # composed features
            pl.BlockSpec((hd, c), lambda j: (0, 0)),
            pl.BlockSpec((hd, 1), lambda j: (0, 0)),
            pl.BlockSpec((ncls, hd), lambda j: (0, 0)),
            pl.BlockSpec((ncls, 1), lambda j: (0, 0)),
        ],
        out_specs=pl.BlockSpec((1, N_BLK), lambda j: (0, j)),
        compiler_params=pltpu.CompilerParams(
            dimension_semantics=("parallel",), vmem_limit_bytes=_VMEM_LIMIT),
    )(flat_idx, feat, w1t, b1c, w2t, b2c)


# ---------------------------------------------------------------------------
# Block-flat <-> 2-D composed map conversions (XLA glue, OFF the hot path;
# only used for the encode-only / decode-only API-compat branches).
# ---------------------------------------------------------------------------
def blocks_to_composed(blk, tri_size):
    H, W, D = tri_size
    C = blk.shape[0]
    xy = blk[:, :H * W].reshape(C, H, W)
    xz = blk[:, H * W:H * W + H * D].reshape(C, H, D)
    yzd = blk[:, H * W + H * D:H * W + H * D + D * W].reshape(C, D, W)
    top = jnp.concatenate([xy, xz], axis=2)
    bot = jnp.concatenate([yzd, jnp.zeros((C, D, D), blk.dtype)], axis=2)
    return jnp.concatenate([top, bot], axis=1)               # (C, H+D, W+D)


def composed_to_blockflat(composed, tri_size, s_pad):
    H, W, D = tri_size
    C = composed.shape[0]
    xy = composed[:, :H, :W].reshape(C, H * W)
    xz = composed[:, :H, W:W + D].reshape(C, H * D)
    yzd = composed[:, H:H + D, :W].reshape(C, D * W)
    blk = jnp.concatenate([xy, xz, yzd], axis=1)
    if s_pad > blk.shape[1]:
        blk = jnp.pad(blk, ((0, 0), (0, s_pad - blk.shape[1])))
    return blk


def point2voxel(args, sample, coords):
    # Scatter predicted labels back into a dense voxel grid (XLA scatter).
    # NOTE: last-write-wins on duplicate coords (matches reference under the
    # unique-coords assumption).
    H, W, D = args["tri_size"]
    grid = jnp.zeros((H, W, D), jnp.int32)
    return grid.at[coords[:, 0], coords[:, 1], coords[:, 2]].set(sample + 1)


# ---------------------------------------------------------------------------
# Synthetic autoencoder / diffusion model / sampler built on the kernels
# ---------------------------------------------------------------------------
class TriplaneAE:
    def __init__(self, params, tri_size):
        H, W, D = tri_size
        self.tri_size = tri_size
        s_tot = H * W + H * D + W * D
        self.s_pad = pl.cdiv(s_tot, S_BLK) * S_BLK          # lane/TC aligned
        w = params["enc_w"]                                  # (Cin, C) f32
        self.C = w.shape[1]
        # Mean-pool folded into the contraction (K = R*Cin); bf16 once.
        self.w_xy = (jnp.tile(w, (D, 1)) / D).astype(jnp.bfloat16)   # (D*Cin, C)
        self.w_xz = (jnp.tile(w, (W, 1)) / W).astype(jnp.bfloat16)   # (W*Cin, C)
        self.w_yz = (jnp.tile(w, (H, 1)) / H).astype(jnp.bfloat16)   # (H*Cin, C)
        self.enc_b = jnp.transpose(params["enc_b"])                   # (C, 1) f32
        # Decoder weights pre-transposed (lane-dense (.., N) layout) + bf16.
        self.dec_w1t = jnp.transpose(params["dec_w1"]).astype(jnp.bfloat16)
        self.dec_b1c = jnp.transpose(params["dec_b1"])
        self.dec_w2t = jnp.transpose(params["dec_w2"]).astype(jnp.bfloat16)
        self.dec_b2c = jnp.transpose(params["dec_b2"])

    def encode(self, condition_cl):
        # condition_cl: (H, W, D, Cin) channels-last.
        H, W, D = self.tri_size
        Cin = condition_cl.shape[-1]
        v_xy = condition_cl.reshape(H * W, D * Cin)                  # pure view
        # TODO(synk): fold these two transposes into the kernel at production
        # sizes (shared projection + in-kernel pools; condition read once).
        v_xz = condition_cl.transpose(0, 2, 1, 3).reshape(H * D, W * Cin)
        v_yz = condition_cl.transpose(2, 1, 0, 3).reshape(D * W, H * Cin)  # d-major
        return encode_compose(v_xy, v_xz, v_yz, self.w_xy, self.w_xz,
                              self.w_yz, self.enc_b, self.s_pad)     # (C, S_pad)

    def decode(self, block_feat, flat_idx):
        # block_feat: (C, S_pad) block-flat composed map; flat_idx: (3, N_pad).
        return decode_labels(flat_idx, block_feat, self.dec_w1t, self.dec_b1c,
                             self.dec_w2t, self.dec_b2c)             # (1, N_pad)


class DenoiserModel:
    def __init__(self, params):
        # Transposed, bf16 weights for the channel-first (C, S) sampler.
        self.w1t = jnp.transpose(params["den_w1"]).astype(jnp.bfloat16)  # (Ch, C)
        self.b1c = jnp.transpose(params["den_b1"])                        # (Ch, 1)
        self.w2t = jnp.transpose(params["den_w2"]).astype(jnp.bfloat16)  # (C, Ch)
        self.b2c = jnp.transpose(params["den_b2"])                        # (C, 1)

    def run(self, x0, cond, y, num_steps):
        return denoise_fused(x0, cond, y, self.w1t, self.b1c, self.w2t,
                             self.b2c, num_steps)


def make_sample_fn(num_steps, init_noise):
    s_pad = init_noise.shape[1]

    def sample_fn(model, out_shape, model_kwargs=None, cond=None, mode=None,
                  overlap=None):
        H = int(model_kwargs['H'][0])
        W = int(model_kwargs['W'][0])
        D = int(model_kwargs['D'][0])
        if cond.ndim == 3:                       # decode-only path: 2-D composed
            cond = composed_to_blockflat(cond, (H, W, D), s_pad)
        # Outpainting mask y rearranged (numpy, zero-cost) to the block layout
        # and folded into the denoise kernel (added once before the loop).
        # NOTE: like the reference, y's (H+D, H+D) shape assumes H == W.
        y2 = np.asarray(model_kwargs['y'][0], np.float32)
        y_blk = np.concatenate([y2[:H, :W].ravel(),
                                y2[:H, W:W + D].ravel(),
                                y2[H:H + D, :W].ravel()])
        y_blk = np.pad(y_blk, (0, s_pad - y_blk.size))
        y_in = jnp.asarray(y_blk.reshape(1, s_pad), jnp.float32)
        return model.run(init_noise, cond, y_in, num_steps)   # (C, S_pad)

    return sample_fn


# ---------------------------------------------------------------------------
# edit_scene -- mirrors the PyTorch module's forward semantics
# ---------------------------------------------------------------------------
class EditScene:
    def __init__(self, args, ae, model, sample_fn, coords, query, out_shape,
                 tri_size, overlap):
        self.args = args
        self.overlap = overlap
        self.model, self.ae = model, ae
        self.sample_fn = sample_fn
        self.coords, self.query = coords, query
        self.out_shape = out_shape
        self.tri_size = tri_size
        H, W, D = tri_size
        self.cond = {'y': np.zeros((1, H + D, H + D)),
                     'H': [H], 'W': [W], 'D': [D], 'path': 0}
        # decompose_featmaps + per-plane gather folded into flat indices into
        # the block-flat composed map [ xy | xz | yz(d-major) | pad ].
        qx, qy, qz = query[:, 0], query[:, 1], query[:, 2]
        off_xz = H * W
        off_yz = H * W + H * D
        idx_xy = qx * W + qy
        idx_xz = off_xz + qx * D + qz
        idx_yz = off_yz + qz * W + qy
        flat_idx = jnp.stack([idx_xy, idx_xz, idx_yz], 0).astype(jnp.int32)
        self.n_query = flat_idx.shape[1]
        n_pad = pl.cdiv(self.n_query, N_BLK) * N_BLK          # lane-dense out
        self.flat_idx = jnp.pad(flat_idx, ((0, 0), (0, n_pad - self.n_query)))

    def encode(self, condition):
        # Returns the block-flat composed map (C, S_pad) -- encode + compose
        # fused into one kernel.
        return self.ae.encode(condition)

    def decode(self, samples):
        # decompose + gather + MLP + argmax fused into one kernel.
        labels = self.ae.decode(samples, self.flat_idx)        # (1, N_pad)
        sample = labels[0, :self.n_query]
        return point2voxel(self.args, sample, self.coords)

    def forward(self, condition, m, encode=True, decode=True):
        condition = jnp.asarray(condition)        # detach().clone() analogue
        if encode and decode:
            before_scene = self.encode(condition)
            samples = self.sample_fn(self.model, self.out_shape,
                                     model_kwargs=self.cond, cond=before_scene,
                                     mode=m, overlap=self.overlap)
            output = self.decode(samples)
        elif encode:
            # encode-only branch returns the standard 2-D composed feature map.
            output = blocks_to_composed(self.encode(condition), self.tri_size)
        elif decode:
            samples = self.sample_fn(self.model, self.out_shape,
                                     model_kwargs=self.cond, cond=condition,
                                     mode=m, overlap=self.overlap)
            output = self.decode(samples)
        else:
            output = None
        return output


# ---------------------------------------------------------------------------
# Main: deterministic small-shape smoke test
# ---------------------------------------------------------------------------
if __name__ == "__main__":
    H, W, D = 16, 16, 8          # tri_size (H == W so cond['y'] broadcast holds)
    Cin = 4                      # condition voxel feature channels
    C = 8                        # triplane feature channels
    Ch = 16                      # denoiser hidden width
    Hd = 32                      # decoder MLP hidden width
    NCLS = 4                     # semantic classes
    N = 64                       # number of query points
    T = 4                        # diffusion steps

    key = jax.random.PRNGKey(0)
    keys = jax.random.split(key, 12)

    params = {
        "enc_w": 0.1 * jax.random.normal(keys[0], (Cin, C), jnp.float32),
        "enc_b": 0.01 * jax.random.normal(keys[1], (1, C), jnp.float32),
        "den_w1": 0.1 * jax.random.normal(keys[2], (C, Ch), jnp.float32),
        "den_b1": 0.01 * jax.random.normal(keys[3], (1, Ch), jnp.float32),
        "den_w2": 0.1 * jax.random.normal(keys[4], (Ch, C), jnp.float32),
        "den_b2": 0.01 * jax.random.normal(keys[5], (1, C), jnp.float32),
        "dec_w1": 0.1 * jax.random.normal(keys[6], (C, Hd), jnp.float32),
        "dec_b1": 0.01 * jax.random.normal(keys[7], (1, Hd), jnp.float32),
        "dec_w2": 0.1 * jax.random.normal(keys[8], (Hd, NCLS), jnp.float32),
        "dec_b2": 0.01 * jax.random.normal(keys[9], (1, NCLS), jnp.float32),
    }

    # condition is channels-last (H, W, D, Cin) so the xy flattening is a view.
    condition = jax.random.normal(keys[10], (H, W, D, Cin), jnp.float32)
    qx = jax.random.randint(jax.random.fold_in(key, 1), (N,), 0, H)
    qy = jax.random.randint(jax.random.fold_in(key, 2), (N,), 0, W)
    qz = jax.random.randint(jax.random.fold_in(key, 3), (N,), 0, D)
    coords = jnp.stack([qx, qy, qz], axis=-1).astype(jnp.int32)
    query = coords                                   # nearest-neighbor queries

    args = {"tri_size": (H, W, D)}
    ae = TriplaneAE(params, (H, W, D))
    model = DenoiserModel(params)
    # init noise lives directly in the block-flat layout (C, S_pad).
    init_noise = jax.random.normal(keys[11], (C, ae.s_pad), jnp.float32)
    sample_fn = make_sample_fn(T, init_noise)
    out_shape = (1, C, H + D, W + D)

    scene = EditScene(args, ae, model, sample_fn, coords, query, out_shape,
                      (H, W, D), overlap=4)

    out_full = scene.forward(condition, m="outpaint", encode=True, decode=True)
    out_enc = scene.forward(condition, m="outpaint", encode=True, decode=False)
    out_dec = scene.forward(out_enc, m="outpaint", encode=False, decode=True)
    jax.block_until_ready((out_full, out_enc, out_dec))

    assert out_full.shape == (H, W, D)
    assert out_enc.shape == (C, H + D, W + D)
    assert out_dec.shape == (H, W, D)
    # decode-only on the returned composed map must reproduce the fused path.
    assert bool(jnp.all(out_dec == out_full))
    print("KERNEL_OK")
</pallas_src>

<mosaic_0001>
module attributes {stable_mosaic.version = 11 : i64} {
  func.func @_encode_compose_kernel(%arg0: i32, %arg1: memref<256x32xf32, #tpu.memory_space<vmem>>, %arg2: memref<128x64xf32, #tpu.memory_space<vmem>>, %arg3: memref<128x64xf32, #tpu.memory_space<vmem>>, %arg4: memref<32x8xbf16, #tpu.memory_space<vmem>>, %arg5: memref<64x8xbf16, #tpu.memory_space<vmem>>, %arg6: memref<64x8xbf16, #tpu.memory_space<vmem>>, %arg7: memref<8x1xf32, #tpu.memory_space<vmem>>, %arg8: memref<8x512xf32, #tpu.memory_space<vmem>>) attributes {dimension_semantics = [#tpu.dimension_semantics<arbitrary>], iteration_bounds = array<i64: 1>, scalar_prefetch = 0 : i64, scratch_operands = 0 : i64, tpu.core_type = #tpu.core_type<tc>, window_params = [{pipeline_mode = #tpu.pipeline_mode<synchronous>, transform_indices = @transform_0, window_bounds = array<i64: 256, 32>}, {pipeline_mode = #tpu.pipeline_mode<synchronous>, transform_indices = @transform_1, window_bounds = array<i64: 128, 64>}, {pipeline_mode = #tpu.pipeline_mode<synchronous>, transform_indices = @transform_2, window_bounds = array<i64: 128, 64>}, {pipeline_mode = #tpu.pipeline_mode<synchronous>, transform_indices = @transform_3, window_bounds = array<i64: 32, 8>}, {pipeline_mode = #tpu.pipeline_mode<synchronous>, transform_indices = @transform_4, window_bounds = array<i64: 64, 8>}, {pipeline_mode = #tpu.pipeline_mode<synchronous>, transform_indices = @transform_5, window_bounds = array<i64: 64, 8>}, {pipeline_mode = #tpu.pipeline_mode<synchronous>, transform_indices = @transform_6, window_bounds = array<i64: 8, 1>}, {pipeline_mode = #tpu.pipeline_mode<synchronous>, transform_indices = @transform_7, window_bounds = array<i64: 8, 512>}]} {
    %c0 = arith.constant 0 : index
    %c0_0 = arith.constant 0 : index
    %0 = vector.load %arg7[%c0, %c0_0] : memref<8x1xf32, #tpu.memory_space<vmem>>, vector<8x1xf32>
    %c0_1 = arith.constant 0 : index
    %c0_2 = arith.constant 0 : index
    %1 = vector.load %arg4[%c0_1, %c0_2] : memref<32x8xbf16, #tpu.memory_space<vmem>>, vector<32x8xbf16>
    %c0_3 = arith.constant 0 : index
    %c0_4 = arith.constant 0 : index
    %2 = vector.load %arg1[%c0_3, %c0_4] : memref<256x32xf32, #tpu.memory_space<vmem>>, vector<256x32xf32>
    %3 = arith.truncf %2 : vector<256x32xf32> to vector<256x32xbf16>
    %cst = arith.constant dense<0.000000e+00> : vector<8x256xf32>
    %4 = tpu.matmul %1, %3, %cst {dimension_numbers = #tpu.dot_dimension_numbers<[0], [1], [1], [0], [0, 1, 1, 0], [], []>} : vector<32x8xbf16>, vector<256x32xbf16>, vector<8x256xf32> -> vector<8x256xf32>
    %5 = vector.broadcast %0 : vector<8x1xf32> to vector<8x256xf32>
    %6 = arith.addf %4, %5 : vector<8x256xf32>
    %c0_5 = arith.constant 0 : index
    %c0_6 = arith.constant 0 : index
    %7 = vector.load %arg8[%c0_5, %c0_6] : memref<8x512xf32, #tpu.memory_space<vmem>>, vector<8x256xf32>
    tpu.vector_store %arg8[%c0_5, %c0_6], %6 {strides = array<i32>} : memref<8x512xf32, #tpu.memory_space<vmem>>, vector<8x256xf32>,
    %c0_7 = arith.constant 0 : index
    %c0_8 = arith.constant 0 : index
    %8 = vector.load %arg5[%c0_7, %c0_8] : memref<64x8xbf16, #tpu.memory_space<vmem>>, vector<64x8xbf16>
    %c0_9 = arith.constant 0 : index
    %c0_10 = arith.constant 0 : index
    %9 = vector.load %arg2[%c0_9, %c0_10] : memref<128x64xf32, #tpu.memory_space<vmem>>, vector<128x64xf32>
    %10 = arith.truncf %9 : vector<128x64xf32> to vector<128x64xbf16>
    %cst_11 = arith.constant dense<0.000000e+00> : vector<8x128xf32>
    %11 = tpu.matmul %8, %10, %cst_11 {dimension_numbers = #tpu.dot_dimension_numbers<[0], [1], [1], [0], [0, 1, 1, 0], [], []>} : vector<64x8xbf16>, vector<128x64xbf16>, vector<8x128xf32> -> vector<8x128xf32>
    %12 = vector.broadcast %0 : vector<8x1xf32> to vector<8x128xf32>
    %13 = arith.addf %11, %12 : vector<8x128xf32>
    %c0_12 = arith.constant 0 : index
    %c256 = arith.constant 256 : index
    %14 = vector.load %arg8[%c0_12, %c256] : memref<8x512xf32, #tpu.memory_space<vmem>>, vector<8x128xf32>
    tpu.vector_store %arg8[%c0_12, %c256], %13 {strides = array<i32>} : memref<8x512xf32, #tpu.memory_space<vmem>>, vector<8x128xf32>,
    %c0_13 = arith.constant 0 : index
    %c0_14 = arith.constant 0 : index
    %15 = vector.load %arg6[%c0_13, %c0_14] : memref<64x8xbf16, #tpu.memory_space<vmem>>, vector<64x8xbf16>
    %c0_15 = arith.constant 0 : index
    %c0_16 = arith.constant 0 : index
    %16 = vector.load %arg3[%c0_15, %c0_16] : memref<128x64xf32, #tpu.memory_space<vmem>>, vector<128x64xf32>
    %17 = arith.truncf %16 : vector<128x64xf32> to vector<128x64xbf16>
    %cst_17 = arith.constant dense<0.000000e+00> : vector<8x128xf32>
    %18 = tpu.matmul %15, %17, %cst_17 {dimension_numbers = #tpu.dot_dimension_numbers<[0], [1], [1], [0], [0, 1, 1, 0], [], []>} : vector<64x8xbf16>, vector<128x64xbf16>, vector<8x128xf32> -> vector<8x128xf32>
    %19 = vector.broadcast %0 : vector<8x1xf32> to vector<8x128xf32>
    %20 = arith.addf %18, %19 : vector<8x128xf32>
    %c0_18 = arith.constant 0 : index
    %c384 = arith.constant 384 : index
    %21 = vector.load %arg8[%c0_18, %c384] : memref<8x512xf32, #tpu.memory_space<vmem>>, vector<8x128xf32>
    tpu.vector_store %arg8[%c0_18, %c384], %20 {strides = array<i32>} : memref<8x512xf32, #tpu.memory_space<vmem>>, vector<8x128xf32>,
    return
  }
  func.func @transform_0(%arg0: i32) -> (i32, i32) {
    %c0_i32 = arith.constant 0 : i32
    %c0_i32_0 = arith.constant 0 : i32
    %c0_i32_1 = arith.constant 0 : i32
    return %c0_i32, %c0_i32_0 : i32, i32
  }
  func.func @transform_1(%arg0: i32) -> (i32, i32) {
    %c0_i32 = arith.constant 0 : i32
    %c0_i32_0 = arith.constant 0 : i32
    %c0_i32_1 = arith.constant 0 : i32
    return %c0_i32, %c0_i32_0 : i32, i32
  }
  func.func @transform_2(%arg0: i32) -> (i32, i32) {
    %c0_i32 = arith.constant 0 : i32
    %c0_i32_0 = arith.constant 0 : i32
    %c0_i32_1 = arith.constant 0 : i32
    return %c0_i32, %c0_i32_0 : i32, i32
  }
  func.func @transform_3(%arg0: i32) -> (i32, i32) {
    %c0_i32 = arith.constant 0 : i32
    %c0_i32_0 = arith.constant 0 : i32
    %c0_i32_1 = arith.constant 0 : i32
    return %c0_i32, %c0_i32_0 : i32, i32
  }
  func.func @transform_4(%arg0: i32) -> (i32, i32) {
    %c0_i32 = arith.constant 0 : i32
    %c0_i32_0 = arith.constant 0 : i32
    %c0_i32_1 = arith.constant 0 : i32
    return %c0_i32, %c0_i32_0 : i32, i32
  }
  func.func @transform_5(%arg0: i32) -> (i32, i32) {
    %c0_i32 = arith.constant 0 : i32
    %c0_i32_0 = arith.constant 0 : i32
    %c0_i32_1 = arith.constant 0 : i32
    return %c0_i32, %c0_i32_0 : i32, i32
  }
  func.func @transform_6(%arg0: i32) -> (i32, i32) {
    %c0_i32 = arith.constant 0 : i32
    %c0_i32_0 = arith.constant 0 : i32
    %c0_i32_1 = arith.constant 0 : i32
    return %c0_i32, %c0_i32_0 : i32, i32
  }
  func.func @transform_7(%arg0: i32) -> (i32, i32) {
    %c0_i32 = arith.constant 0 : i32
    %c0_i32_0 = arith.constant 0 : i32
    %c0_i32_1 = arith.constant 0 : i32
    return %c0_i32, %c0_i32_0 : i32, i32
  }
}

</mosaic_0001>

<bundles_post_ra>
// kernel: tpu_custom_call.1
= control target key start
LH: loop header
LB: loop body
LE: loop exit
PB: predicated region body
PF: predicated region fallthrough
CT: control target
= control target key end

     0   :  { %vm114_vm0 = vcmask 261120   ;;  %v641_v5 = vmov 0.0   ;;  %vm281_vm1 = vcmask 523264   ;;  %s978_s0 = inlined_call_operand.vmem [shape: f32[256,32], index: 0, kind: input, shape index: {}]   ;;  %s979_s1 = inlined_call_operand.vmem [shape: f32[128,64], index: 1, kind: input, shape index: {}]   ;;  %s980_s2 = inlined_call_operand.vmem [shape: f32[128,64], index: 2, kind: input, shape index: {}]   ;;  %s981_s3 = inlined_call_operand.vmem [shape: bf16[32,8], index: 3, kind: input, shape index: {}]   ;;  %s982_s4 = inlined_call_operand.vmem [shape: bf16[64,8], index: 4, kind: input, shape index: {}]   ;;  %s983_s5 = inlined_call_operand.vmem [shape: bf16[64,8], index: 5, kind: input, shape index: {}]   ;;  %s984_s6 = inlined_call_operand.vmem [shape: f32[8,1], index: 6, kind: input, shape index: {}]   ;;  %s985_s7 = inlined_call_operand.hbm [shape: f32[8,512], index: 7, kind: output, shape index: {}]  }
   0x1   :  { %v607_v0 = vld [vmem:[%s981_s3] sm:$0xff]   ;;  %v608_v1 = vld [vmem:[%s981_s3 + $0x8] sm:$0xff]   ;;  %553 = vmatprep.subr.bf16.mxu1 %v641_v5  ;;  %v51_v8 = vld [vmem:[%s978_s0 + $0x90] sm:$0xff] }
   0x2   :  { %98 = vxpose.xlu0.c.b16.start [1/2] (short) (narrow) %v607_v0, 16  ;;  %v49_v2 = vld [vmem:[%s978_s0 + $0x80] sm:$0xff]  ;;  %v50_v3 = vld [vmem:[%s978_s0 + $0x88] sm:$0xff]  ;;  %v52_v9 = vld [vmem:[%s978_s0 + $0x98] sm:$0xff] }
   0x3   :  { %v33_v4 = vld [vmem:[%s978_s0] sm:$0xff]  ;;  %v73_v6 = vpack.c.bf16 %v50_v3, %v49_v2  ;;  %v34_v7 = vld [vmem:[%s978_s0 + $0x8] sm:$0xff]  ;;  %v74_v11 = vpack.c.bf16 %v52_v9, %v51_v8  ;;  %v35_v12 = vld [vmem:[%s978_s0 + $0x10] sm:$0xff] }
   0x4   :  { %v65_v10 = vpack.c.bf16 %v34_v7, %v33_v4  ;;  %v36_v13 = vld [vmem:[%s978_s0 + $0x18] sm:$0xff]  ;;  %v609_v15 = vld [vmem:[%s982_s4] sm:$0xff]   ;;  %v54_v18 = vld [vmem:[%s978_s0 + $0xa8] sm:$0xff] }
   0x5   :  { %593 = vmatprep.subr.msk.bf16.mxu0 %vm114_vm0, %v73_v6  ;;  %v66_v16 = vpack.c.bf16 %v36_v13, %v35_v12  ;;  %v53_v17 = vld [vmem:[%s978_s0 + $0xa0] sm:$0xff]  ;;  %265 = vxpose.xlu1.c.b16.start [1/4] (short) (narrow) %v609_v15, 16  ;;  %v611_v20 = vld [vmem:[%s982_s4 + $0x8] sm:$0xff]   ;;  %v613_v26 = vld [vmem:[%s982_s4 + $0x10] sm:$0xff]  }
   0x6   :  { %99 = vxpose.xlu0.c.b16.end [2/2] (short) (narrow) %v608_v1, 16  ;;  %v119_v14 = vsel %vm114_vm0, %v65_v10, 0  ;;  %v610_v19 = vld [vmem:[%s983_s5] sm:$0xff]   ;;  %v612_v21 = vld [vmem:[%s983_s5 + $0x8] sm:$0xff]   ;;  %v75_v23 = vpack.c.bf16 %v54_v18, %v53_v17  ;;  %v614_v27 = vld [vmem:[%s983_s5 + $0x10] sm:$0xff]  }
   0x7   :  { %518 = vmatpush3.bf16.xpose.msra.mxu0 %v119_v14  ;;  %v122_v22 = vsel %vm114_vm0, %v66_v16, 0  ;;  %v37_v24 = vld [vmem:[%s978_s0 + $0x20] sm:$0xff]  ;;  %v38_v25 = vld [vmem:[%s978_s0 + $0x28] sm:$0xff]  ;;  %v55_v29 = vld [vmem:[%s978_s0 + $0xb0] sm:$0xff] }
   0x8   :  { %594 = vmatprep.subr.msk.bf16.mxu0 %vm114_vm0, %v74_v11  ;;  %v67_v28 = vpack.c.bf16 %v38_v25, %v37_v24  ;;  %v56_v30 = vld [vmem:[%s978_s0 + $0xb8] sm:$0xff]  ;;  %v39_v35 = vld [vmem:[%s978_s0 + $0x30] sm:$0xff]  ;;  %v217_v37 = vld [vmem:[%s979_s1] sm:$0xff] }
   0x9   :  { %266 = vxpose.xlu1.c.b16.cont [2/4] (short) (narrow) %v611_v20, 16  ;;  %v615_v31 = vld [vmem:[%s982_s4 + $0x18] sm:$0xff]   ;;  %v76_v34 = vpack.c.bf16 %v56_v30, %v55_v29  ;;  %v218_v38 = vld [vmem:[%s979_s1 + $0x8] sm:$0xff]  ;;  %v219_v40 = vld [vmem:[%s979_s1 + $0x10] sm:$0xff] }
   0xa   :  { %406 = vxpose.xlu0.c.b16.start [1/4] (short) (narrow) %v610_v19, 16  ;;  %v616_v32 = vld [vmem:[%s983_s5 + $0x18] sm:$0xff]   ;;  %v125_v33 = vsel %vm114_vm0, %v67_v28, 0  ;;  %v233_v39 = vpack.c.bf16 %v218_v38, %v217_v37  ;;  %v57_v44 = vld [vmem:[%s978_s0 + $0xc0] sm:$0xff]  ;;  %v58_v45 = vld [vmem:[%s978_s0 + $0xc8] sm:$0xff] }
   0xb   :  { %v40_v36 = vld [vmem:[%s978_s0 + $0x38] sm:$0xff]  ;;  %v77_v48 = vpack.c.bf16 %v58_v45, %v57_v44  ;;  %v41_v49 = vld [vmem:[%s978_s0 + $0x40] sm:$0xff]  ;;  %v42_v50 = vld [vmem:[%s978_s0 + $0x48] sm:$0xff] }
   0xc   :  { %v220_v41 = vld [vmem:[%s979_s1 + $0x18] sm:$0xff]  ;;  %v68_v42 = vpack.c.bf16 %v40_v36, %v39_v35  ;;  %v286_v43 = vsel %vm281_vm1, %v233_v39, 0  ;;  %v221_v52 = vld [vmem:[%s979_s1 + $0x20] sm:$0xff]  ;;  %v222_v53 = vld [vmem:[%s979_s1 + $0x28] sm:$0xff] }
   0xd   :  { %267 = vxpose.xlu1.c.b16.cont [3/4] (short) (narrow) %v613_v26, 16  ;;  %554 = vmatpush3.bf16.xpose.msra.mxu1 %v286_v43  ;;  %v234_v46 = vpack.c.bf16 %v220_v41, %v219_v40 }
   0xe   :  { %407 = vxpose.xlu0.c.b16.cont [2/4] (short) (narrow) %v612_v21, 16  ;;  %555 = vmatprep.subr.bf16.mxu1 %v641_v5  ;;  %v128_v47 = vsel %vm114_vm0, %v68_v42, 0 }
   0xf   :  { %520 = vmatpush3.bf16.xpose.msra.mxu0 %v122_v22  ;;  %v289_v51 = vsel %vm281_vm1, %v234_v46, 0 }
  0x10   :  { %595 = vmatprep.subr.msk.bf16.mxu0 %vm114_vm0, %v75_v23 }
  0x11   :  { %268 = vxpose.xlu1.c.b16.end [4/4] (short) (narrow) %v615_v31, 16 }
  0x12   :  { %408 = vxpose.xlu0.c.b16.cont [3/4] (short) (narrow) %v614_v27, 16 }
  0x16   :  { %409 = vxpose.xlu0.c.b16.end [4/4] (short) (narrow) %v616_v32, 16 }
  0x17   :  { %522 = vmatpush3.bf16.xpose.msra.mxu0 %v125_v33 }
  0x18   :  { %596 = vmatprep.subr.msk.bf16.mxu0 %vm114_vm0, %v76_v34 }
  0x1f   :  { %524 = vmatpush3.bf16.xpose.msra.mxu0 %v128_v47 }
  0x20   :  { %12 = vsyncpa [#allocation3], 0  ;;  %597 = vmatprep.subr.msk.bf16.mxu0 %vm114_vm0, %v77_v48  ;;  %v69_v54 = vpack.c.bf16 %v42_v50, %v41_v49  ;;  %v59_v55 = vld [vmem:[%s978_s0 + $0xd0] sm:$0xff]  ;;  %v60_v56 = vld [vmem:[%s978_s0 + $0xd8] sm:$0xff]  ;;  %556 = vmatpush3.bf16.xpose.msra.mxu1 %v289_v51  ;;  %v235_v57 = vpack.c.bf16 %v222_v53, %v221_v52  ;;  %vm642_vm2 = vmmov 0   ;;  %v643_v7 = vmov 0  }
  0x21   :  { %557 = vmatprep.subr.bf16.mxu1 %v641_v5  ;;  %v78_v59 = vpack.c.bf16 %v60_v56, %v59_v55  ;;  %569 = vmatprep.mubr.msk.bf16.mxu1 %vm642_vm2, %v641_v5  ;;  %v43_v60 = vld [vmem:[%s978_s0 + $0x50] sm:$0xff]  ;;  %v44_v61 = vld [vmem:[%s978_s0 + $0x58] sm:$0xff]  ;;  %v61_v2 = vld [vmem:[%s978_s0 + $0xe0] sm:$0xff] }
  0x22   :  { %v131_v58 = vsel %vm114_vm0, %v69_v54, 0  ;;  %v292_v62 = vsel %vm281_vm1, %v235_v57, 0  ;;  %v223_v63 = vld [vmem:[%s979_s1 + $0x30] sm:$0xff]  ;;  %v224_v0 = vld [vmem:[%s979_s1 + $0x38] sm:$0xff]  ;;  %v70_v1 = vpack.c.bf16 %v44_v61, %v43_v60  ;;  %v62_v3 = vld [vmem:[%s978_s0 + $0xe8] sm:$0xff]  ;;  %605 = vset.pattern.permute.xlu1 %v643_v7  ;;  %606 = vset.pattern.permute.xlu0 %v643_v7 }
  0x23   :  { %v236_v4 = vpack.c.bf16 %v224_v0, %v223_v63  ;;  %v28_v6 = vld [vmem:[%s984_s6] sm:$0xff]  ;;  %v79_v9 = vpack.c.bf16 %v62_v3, %v61_v2  ;;  %v46_v11 = vld [vmem:[%s978_s0 + $0x68] sm:$0xff]  ;;  %v63_v16 = vld [vmem:[%s978_s0 + $0xf0] sm:$0xff] }
  0x24   :  { %v134_v8 = vsel %vm114_vm0, %v70_v1, 0  ;;  %83 = vperm.xlu1 %605, %v28_v6   ;;  %v45_v10 = vld [vmem:[%s978_s0 + $0x60] sm:$0xff]  ;;  %v226_v14 = vld [vmem:[%s979_s1 + $0x48] sm:$0xff]  ;;  %v64_v17 = vld [vmem:[%s978_s0 + $0xf8] sm:$0xff] }
  0x25   :  { %v295_v12 = vsel %vm281_vm1, %v236_v4, 0  ;;  %v225_v13 = vld [vmem:[%s979_s1 + $0x40] sm:$0xff]  ;;  %v71_v15 = vpack.c.bf16 %v46_v11, %v45_v10  ;;  %v80_v20 = vpack.c.bf16 %v64_v17, %v63_v16  ;;  %v47_v21 = vld [vmem:[%s978_s0 + $0x70] sm:$0xff]  ;;  %v48_v22 = vld [vmem:[%s978_s0 + $0x78] sm:$0xff] }
  0x26   :  { %v237_v18 = vpack.c.bf16 %v226_v14, %v225_v13  ;;  %v227_v24 = vld [vmem:[%s979_s1 + $0x50] sm:$0xff]  ;;  %v228_v25 = vld [vmem:[%s979_s1 + $0x58] sm:$0xff]  ;;  %v72_v26 = vpack.c.bf16 %v48_v22, %v47_v21  ;;  %v229_v30 = vld [vmem:[%s979_s1 + $0x60] sm:$0xff] }
  0x27   :  { %526 = vmatpush3.bf16.xpose.msra.mxu0 %v131_v58  ;;  %v137_v19 = vsel %vm114_vm0, %v71_v15, 0  ;;  %v238_v27 = vpack.c.bf16 %v228_v25, %v227_v24  ;;  %v230_v31 = vld [vmem:[%s979_s1 + $0x68] sm:$0xff]  ;;  %v231_v34 = vld [vmem:[%s979_s1 + $0x70] sm:$0xff]  ;;  %v232_v35 = vld [vmem:[%s979_s1 + $0x78] sm:$0xff] }
  0x28   :  { %598 = vmatprep.subr.msk.bf16.mxu0 %vm114_vm0, %v78_v59  ;;  %558 = vmatpush3.bf16.xpose.msra.mxu1 %v292_v62  ;;  %v298_v23 = vsel %vm281_vm1, %v237_v18, 0  ;;  %v140_v28 = vsel %vm114_vm0, %v72_v26, 0  ;;  %v239_v32 = vpack.c.bf16 %v230_v31, %v229_v30  ;;  %v240_v36 = vpack.c.bf16 %v232_v35, %v231_v34  ;;  %v358_v38 = vld [vmem:[%s980_s2] sm:$0xff]  ;;  %v359_v39 = vld [vmem:[%s980_s2 + $0x8] sm:$0xff]  ;;  %v360_v43 = vld [vmem:[%s980_s2 + $0x10] sm:$0xff] }
  0x29   :  { %559 = vmatprep.subr.bf16.mxu1 %v641_v5  ;;  %v301_v29 = vsel %vm281_vm1, %v238_v27, 0  ;;  %v374_v40 = vpack.c.bf16 %v359_v39, %v358_v38  ;;  %v361_v44 = vld [vmem:[%s980_s2 + $0x18] sm:$0xff]  ;;  %v362_v48 = vld [vmem:[%s980_s2 + $0x20] sm:$0xff]  ;;  %v363_v49 = vld [vmem:[%s980_s2 + $0x28] sm:$0xff] }
  0x2a   :  { %v304_v33 = vsel %vm281_vm1, %v239_v32, 0  ;;  %v307_v37 = vsel %vm281_vm1, %v240_v36, 0  ;;  %v375_v45 = vpack.c.bf16 %v361_v44, %v360_v43  ;;  %v376_v50 = vpack.c.bf16 %v363_v49, %v362_v48  ;;  %v364_v52 = vld [vmem:[%s980_s2 + $0x30] sm:$0xff]  ;;  %v365_v53 = vld [vmem:[%s980_s2 + $0x38] sm:$0xff]  ;;  %v366_v56 = vld [vmem:[%s980_s2 + $0x40] sm:$0xff] }
  0x2b   :  { %v426_v42 = vsel %vm281_vm1, %v374_v40, 0  ;;  %v377_v54 = vpack.c.bf16 %v365_v53, %v364_v52  ;;  %v367_v57 = vld [vmem:[%s980_s2 + $0x48] sm:$0xff]  ;;  %v368_v60 = vld [vmem:[%s980_s2 + $0x50] sm:$0xff]  ;;  %v369_v61 = vld [vmem:[%s980_s2 + $0x58] sm:$0xff] }
  0x2c   :  { %v429_v47 = vsel %vm281_vm1, %v375_v45, 0  ;;  %v432_v51 = vsel %vm281_vm1, %v376_v50, 0  ;;  %v378_v58 = vpack.c.bf16 %v367_v57, %v366_v56  ;;  %v379_v62 = vpack.c.bf16 %v369_v61, %v368_v60  ;;  %v370_v0 = vld [vmem:[%s980_s2 + $0x60] sm:$0xff]  ;;  %v371_v1 = vld [vmem:[%s980_s2 + $0x68] sm:$0xff]  ;;  %v372_v4 = vld [vmem:[%s980_s2 + $0x70] sm:$0xff] }
  0x2d   :  { %v435_v55 = vsel %vm281_vm1, %v377_v54, 0  ;;  %v380_v2 = vpack.c.bf16 %v371_v1, %v370_v0  ;;  %v373_v6 = vld [vmem:[%s980_s2 + $0x78] sm:$0xff]  ;;  %s644_s2 = smov [#allocation2]  }
  0x2e   :  { %v438_v59 = vsel %vm281_vm1, %v378_v58, 0  ;;  %v441_v63 = vsel %vm281_vm1, %v379_v62, 0  ;;  %v381_v7 = vpack.c.bf16 %v373_v6, %v372_v4  ;;  %s496_s17 = sshll.u32 %s644_s2, 4  ;;  %s497_s17 = int_to_ptr.vmem [resolvable:$true] %s496_s17 }
  0x2f   :  { %528 = vmatpush3.bf16.xpose.msra.mxu0 %v134_v8  ;;  %v444_v3 = vsel %vm281_vm1, %v380_v2, 0  ;;  %s617_s1 = scalar_lea.vmem %s497_s17, 512  ;;  %p622_p1 = scmp.lt.s32.totalorder %s497_s17, %s497_s17 }
  0x30   :  { %599 = vmatprep.subr.msk.bf16.mxu0 %vm114_vm0, %v79_v9  ;;  %560 = vmatpush3.bf16.xpose.msra.mxu1 %v295_v12  ;;  %v447_v8 = vsel %vm281_vm1, %v381_v7, 0  ;;  %p618_p0 = scmp.ne.s32.totalorder %s497_s17, %s617_s1  ;;  %p623_p2 = scmp.lt.s32.totalorder %s617_s1, %s617_s1 }
  0x31   :  { %561 = vmatprep.subr.bf16.mxu1 %v641_v5 }
  0x32   :  { %p624_p3 = por %p623_p2, %p622_p1 }
  0x34   :  { %p625_p4 = pnand %p624_p3, %p618_p0 }
  0x37   :  { %530 = vmatpush3.bf16.xpose.msra.mxu0 %v137_v19 }
  0x38   :  { %600 = vmatprep.subr.msk.bf16.mxu0 %vm114_vm0, %v80_v20  ;;  %562 = vmatpush3.bf16.xpose.msra.mxu1 %v298_v23 }
  0x39   :  { %563 = vmatprep.subr.bf16.mxu1 %v641_v5 }
  0x3f   :  { %532 = vmatpush3.bf16.xpose.msra.mxu0 %v140_v28 }
  0x40   :  { %573 = vmatprep.subr.bf16.mxu0 %v641_v5  ;;  %564 = vmatpush3.bf16.xpose.msra.mxu1 %v301_v29 }
  0x41   :  { %565 = vmatprep.subr.bf16.mxu1 %v641_v5 }
  0x48   :  { %566 = vmatpush3.bf16.xpose.msra.mxu1 %v304_v33 }
  0x49   :  { %567 = vmatprep.subr.bf16.mxu1 %v641_v5 }
  0x50   :  { %568 = vmatpush3.bf16.xpose.msra.mxu1 %v307_v37 }
  0x68   :  { %v106_v41 = vpop.trf.xlu0 }
  0x69   :  { %533 = vmatprep.mubr.msk.bf16.mxu0 %vm114_vm0, %v106_v41 }
  0x6a   :  { %534 = vmatmul.mubr.msk.bf16.vlgmr.msra.gmra.mrb[0].mxu0 %vm114_vm0, %v106_v41 }
  0x6b   :  { %574 = vmatpush3.bf16.xpose.msra.mxu0 %v426_v42  ;;  %589 = vmatprep.mubr.msk.bf16.mxu0 %vm642_vm2, %v641_v5  ;;  %v273_v46 = vpop.trf.xlu1 }
  0x6c   :  { %575 = vmatprep.subr.bf16.mxu0 %v641_v5  ;;  %570 = vmatmul.mubr.msk.bf16.vlgmr.msra.gmra.mrb[0].mxu1 %vm281_vm1, %v273_v46 }
  0x70   :  { %v414_v9 = vpop.trf.xlu0 }
  0x73   :  { %576 = vmatpush3.bf16.xpose.msra.mxu0 %v429_v47 }
  0x74   :  { %577 = vmatprep.subr.bf16.mxu0 %v641_v5 }
  0x7b   :  { %578 = vmatpush3.bf16.xpose.msra.mxu0 %v432_v51 }
  0x7c   :  { %579 = vmatprep.subr.bf16.mxu0 %v641_v5 }
  0x83   :  { %580 = vmatpush3.bf16.xpose.msra.mxu0 %v435_v55 }
  0x84   :  { %581 = vmatprep.subr.bf16.mxu0 %v641_v5 }
  0x8b   :  { %582 = vmatpush3.bf16.xpose.msra.mxu0 %v438_v59 }
  0x8c   :  { %583 = vmatprep.subr.bf16.mxu0 %v641_v5 }
  0x93   :  { %584 = vmatpush3.bf16.xpose.msra.mxu0 %v441_v63 }
  0x94   :  { %585 = vmatprep.subr.bf16.mxu0 %v641_v5 }
  0x9b   :  { %586 = vmatpush3.bf16.xpose.msra.mxu0 %v444_v3 }
  0x9c   :  { %587 = vmatprep.subr.bf16.mxu0 %v641_v5 }
  0xa3   :  { %588 = vmatpush3.bf16.xpose.msra.mxu0 %v447_v8  ;;  %v84_v10 = vpop.permute.xlu1 %83 }
  0xaa   :  { %590 = vmatmul.mubr.msk.bf16.vlgmr.msra.gmra.mrb[4].mxu0 %vm281_vm1, %v414_v9 }
 0x13d   :  { %v200_v11 = vpop.f32.mrb[0].mxu0 }
 0x13e   :  { %v201_v12 = vadd.f32 %v200_v11, %v84_v10  ;;  %v202_v13 = vpop.f32.mrb[1].mxu0 }
 0x13f   :  { %v203_v14 = vadd.f32 %v202_v13, %v84_v10  ;;  %v204_v15 = vpop.f32.mrb[2].mxu0  ;;  %v343_v17 = vpop.f32.mrb[0].mxu1 }
 0x140   :  { %207 = vst [vmem:[#allocation2] sm:$0xff] %v201_v12  ;;  %v205_v16 = vpop.f32.mrb[3].mxu0  ;;  %v344_v18 = vadd.f32 %v343_v17, %v84_v10  ;;  %v571_v19 = vpop.f32.mrb[1].mxu1 }
 0x141   :  { %208 = vst [vmem:[#allocation2 + $0x8] sm:$0xff] %v203_v14  ;;  %v346_v5 = vpop.f32.mrb[2].mxu1 }
 0x142   :  { %349 = vst [vmem:[#allocation2 + $0x10] sm:$0xff] %v344_v18  ;;  %v572_v20 = vpop.f32.mrb[3].mxu1 }
 0x17d   :  { %v483_v21 = vpop.f32.mrb[4].mxu0 }
 0x17e   :  { %v484_v22 = vadd.f32 %v483_v21, %v84_v10  ;;  %v591_v23 = vpop.f32.mrb[5].mxu0 }
 0x17f   :  { %v486_v24 = vpop.f32.mrb[6].mxu0 }
 0x180   :  { %489 = vst [vmem:[#allocation2 + $0x18] sm:$0xff] %v484_v22  ;;  %v592_v25 = vpop.f32.mrb[7].mxu0 }
 0x181   :  { %628 = shalt.err (!%p625_p4)
}
 0x182   :  { %s629_s19 = scalar_lea.hbm %s985_s7, 512 }
 0x183   :  { %p630_p5 = scmp.ne.s32.totalorder %s985_s7, %s629_s19  ;;  %p633_p6 = scmp.lt.u32.totalorder %s629_s19, %s985_s7 }
 0x185   :  { %p635_p7 = pnand %p633_p6, %p630_p5 }
 0x187   :  { %638 = shalt.err (!%p635_p7)
}
 0x188   :  { %499 = dma.vmem_to_hbm [thread:$0]  %s497_s17, 512, %s985_s7, [#allocation3]  }
 0x189   :  { %639 = dma.done.wait [#allocation3], 512  }
 0x18a   :  { %640 = vsyncadd [#allocation3], 4294966784 }
 0x18b   :  { %503 = vsyncpa [#allocation3], 1 }

</bundles_post_ra>
